<compile_context>
chip_gen: v5e
topology: v5e:2x2
jax: 0.10.0
libtpu: 0.0.40
codegen_flags: <defaults>
</compile_context>

<pallas_src>
import functools
import math

import jax
import jax.numpy as jnp
import numpy as np
from jax.experimental import pallas as pl
from jax.experimental.pallas import tpu as pltpu


def _attention_block_kernel(x_ref, wq_ref, wk_ref, wv_ref, wo_ref, out_ref,
                            ctx_ref, *, num_heads, head_dim, batch_block,
                            seq_len, hidden):
    # x_ref:   (batch_block*seq_len, hidden) bf16   (rows = packed batch*seq)
    # w*_ref:  (hidden, hidden) bf16, already (in, out) layout -> y = x @ w
    # out_ref: (1, 8, 128) f32 lane-dense partial-sum tile for this block
    # ctx_ref: (batch_block*seq_len, hidden) f32 VMEM scratch for head outputs
    x2 = x_ref[...]

    # Projections with M = batch_block*seq_len packed rows (bias=False).
    q = jnp.dot(x2, wq_ref[...], preferred_element_type=jnp.float32)
    k = jnp.dot(x2, wk_ref[...], preferred_element_type=jnp.float32)
    v = jnp.dot(x2, wv_ref[...], preferred_element_type=jnp.float32)

    scale = 1.0 / math.sqrt(head_dim)

    for h in range(num_heads):
        lo = h * head_dim
        hi = lo + head_dim
        # Static column slice per head, then split the packed rows back into
        # (batch_block, seq_len) — a sublane-tile-aligned leading-dim split.
        qh = q[:, lo:hi].reshape(batch_block, seq_len, head_dim)
        kh = k[:, lo:hi].reshape(batch_block, seq_len, head_dim)
        vh = v[:, lo:hi].reshape(batch_block, seq_len, head_dim)

        # Batched (over batch_block) attention for this head, bf16 on the MXU,
        # f32 accumulation / softmax.
        s = jnp.einsum("bqd,bkd->bqk", qh.astype(jnp.bfloat16),
                       kh.astype(jnp.bfloat16),
                       preferred_element_type=jnp.float32) * scale
        s = s - jnp.max(s, axis=-1, keepdims=True)
        p = jnp.exp(s)
        p = p * pl.reciprocal(jnp.sum(p, axis=-1, keepdims=True), approx=True)
        # dropout(p=0.0) is the identity -> nothing to do.
        oh = jnp.einsum("bqk,bkd->bqd", p.astype(jnp.bfloat16),
                        vh.astype(jnp.bfloat16),
                        preferred_element_type=jnp.float32)
        # Write this head's output directly into the (rows, hidden) scratch
        # slab instead of a lane-dim concatenate.
        ctx_ref[:, lo:hi] = oh.reshape(batch_block * seq_len, head_dim)

    # Output projection on the packed (rows, hidden) slab, then the block's
    # partial scalar sum, broadcast into a lane-dense (8,128) tile.
    o = jnp.dot(ctx_ref[...].astype(jnp.bfloat16), wo_ref[...],
                preferred_element_type=jnp.float32)
    out_ref[...] = jnp.broadcast_to(jnp.sum(o), out_ref.shape)


def attention_model_sum(x, wq, wk, wv, wo, *, num_heads):
    """Pallas implementation of AttentionModel.forward (returns a scalar)."""
    bsz, seq_len, hidden = x.shape
    head_dim = hidden // num_heads

    # Pick a batch block so each grid step carries ~256 packed rows (whole
    # batch here). bsz must be divisible by the block.
    bb = max(1, min(bsz, max(1, 256 // seq_len)))
    while bsz % bb:
        bb -= 1
    num_blocks = bsz // bb
    rows = bb * seq_len

    # Layout plumbing in the wrapper (one-time XLA cost, not per grid step):
    # fold (batch, seq) -> rows, cast to bf16, store weights as (in, out) so
    # the kernel never transposes them.
    x2 = x.reshape(bsz * seq_len, hidden).astype(jnp.bfloat16)
    wq_t = wq.T.astype(jnp.bfloat16)
    wk_t = wk.T.astype(jnp.bfloat16)
    wv_t = wv.T.astype(jnp.bfloat16)
    wo_t = wo.T.astype(jnp.bfloat16)

    kernel = functools.partial(
        _attention_block_kernel, num_heads=num_heads, head_dim=head_dim,
        batch_block=bb, seq_len=seq_len, hidden=hidden)

    # Constant-index weight blocks; if hidden is scaled up, single-buffer them
    # (pipeline_mode=pl.Buffered(1)) and set vmem_limit_bytes to stay inside
    # v7x's 64 MiB VMEM. At hidden=32 the defaults are ample.
    w_spec = pl.BlockSpec((hidden, hidden), lambda b: (0, 0))

    out = pl.pallas_call(
        kernel,
        out_shape=jax.ShapeDtypeStruct((num_blocks, 8, 128), jnp.float32),
        grid_spec=pltpu.PrefetchScalarGridSpec(
            num_scalar_prefetch=0,
            grid=(num_blocks,),
            in_specs=[
                pl.BlockSpec((rows, hidden), lambda b: (b, 0)),
                w_spec, w_spec, w_spec, w_spec,
            ],
            out_specs=pl.BlockSpec((1, 8, 128), lambda b: (b, 0, 0)),
            scratch_shapes=[pltpu.VMEM((rows, hidden), jnp.float32)],
        ),
        compiler_params=pltpu.CompilerParams(
            dimension_semantics=("parallel",)),
    )(x2, wq_t, wk_t, wv_t, wo_t)

    # Every lane of a block's (8,128) tile holds that block's partial sum.
    return jnp.sum(out[:, 0, 0])


def _reference(x, wq, wk, wv, wo, *, num_heads):
    bsz, seq_len, hidden = x.shape
    head_dim = hidden // num_heads
    q = x @ wq.T
    k = x @ wk.T
    v = x @ wv.T
    q = q.reshape(bsz, seq_len, num_heads, head_dim).transpose(0, 2, 1, 3)
    k = k.reshape(bsz, seq_len, num_heads, head_dim).transpose(0, 2, 1, 3)
    v = v.reshape(bsz, seq_len, num_heads, head_dim).transpose(0, 2, 1, 3)
    s = jnp.einsum("bhqd,bhkd->bhqk", q, k) / math.sqrt(head_dim)
    p = jax.nn.softmax(s, axis=-1)
    o = jnp.einsum("bhqk,bhkd->bhqd", p, v)
    o = o.transpose(0, 2, 1, 3).reshape(bsz, seq_len, hidden)
    o = o @ wo.T
    return jnp.sum(o)


if __name__ == "__main__":
    # Small shapes consistent with the module: batch=2, seq=8, hidden=32, heads=4.
    bsz, seq_len, hidden, num_heads = 2, 8, 32, 4

    key = jax.random.PRNGKey(0)
    kx, kq, kk, kv, ko = jax.random.split(key, 5)
    bound = 1.0 / math.sqrt(hidden)   # PyTorch Linear default init range

    x = jax.random.normal(kx, (bsz, seq_len, hidden), dtype=jnp.float32)
    wq = jax.random.uniform(kq, (hidden, hidden), jnp.float32, -bound, bound)
    wk = jax.random.uniform(kk, (hidden, hidden), jnp.float32, -bound, bound)
    wv = jax.random.uniform(kv, (hidden, hidden), jnp.float32, -bound, bound)
    wo = jax.random.uniform(ko, (hidden, hidden), jnp.float32, -bound, bound)

    result = attention_model_sum(x, wq, wk, wv, wo, num_heads=num_heads)
    result = jax.block_until_ready(result)

    ref = _reference(x, wq, wk, wv, wo, num_heads=num_heads)
    # bf16 MXU inputs (f32 accumulation) + approx reciprocal shift the global
    # sum at the ~1e-2 level vs. a pure-f32 reference, so the tolerance is
    # loosened accordingly (per the perf review).
    np.testing.assert_allclose(np.asarray(result), np.asarray(ref),
                               rtol=3e-2, atol=3e-1)
    print("KERNEL_OK")
</pallas_src>

<mosaic_0001>
module attributes {stable_mosaic.version = 11 : i64} {
  func.func @_attention_block_kernel(%arg0: i32, %arg1: memref<16x32xbf16, #tpu.memory_space<vmem>>, %arg2: memref<32x32xbf16, #tpu.memory_space<vmem>>, %arg3: memref<32x32xbf16, #tpu.memory_space<vmem>>, %arg4: memref<32x32xbf16, #tpu.memory_space<vmem>>, %arg5: memref<32x32xbf16, #tpu.memory_space<vmem>>, %arg6: memref<1x8x128xf32, #tpu.memory_space<vmem>>, %arg7: memref<16x32xf32, #tpu.memory_space<vmem>>) attributes {dimension_semantics = [#tpu.dimension_semantics<parallel>], iteration_bounds = array<i64: 1>, scalar_prefetch = 0 : i64, scratch_operands = 1 : i64, tpu.core_type = #tpu.core_type<tc>, window_params = [{transform_indices = @transform_0, window_bounds = array<i64: 16, 32>}, {pipeline_mode = #tpu.pipeline_mode<synchronous>, transform_indices = @transform_1, window_bounds = array<i64: 32, 32>}, {pipeline_mode = #tpu.pipeline_mode<synchronous>, transform_indices = @transform_2, window_bounds = array<i64: 32, 32>}, {pipeline_mode = #tpu.pipeline_mode<synchronous>, transform_indices = @transform_3, window_bounds = array<i64: 32, 32>}, {pipeline_mode = #tpu.pipeline_mode<synchronous>, transform_indices = @transform_4, window_bounds = array<i64: 32, 32>}, {transform_indices = @transform_5, window_bounds = array<i64: 1, 8, 128>}]} {
    %c0 = arith.constant 0 : index
    %c0_0 = arith.constant 0 : index
    %0 = vector.load %arg1[%c0, %c0_0] : memref<16x32xbf16, #tpu.memory_space<vmem>>, vector<16x32xbf16>
    %c0_1 = arith.constant 0 : index
    %c0_2 = arith.constant 0 : index
    %1 = vector.load %arg2[%c0_1, %c0_2] : memref<32x32xbf16, #tpu.memory_space<vmem>>, vector<32x32xbf16>
    %cst = arith.constant dense<0.000000e+00> : vector<16x32xf32>
    %2 = tpu.matmul %0, %1, %cst {dimension_numbers = #tpu.dot_dimension_numbers<[1], [0], [0], [1], [0, 0, 1, 1], [], []>} : vector<16x32xbf16>, vector<32x32xbf16>, vector<16x32xf32> -> vector<16x32xf32>
    %c0_3 = arith.constant 0 : index
    %c0_4 = arith.constant 0 : index
    %3 = vector.load %arg3[%c0_3, %c0_4] : memref<32x32xbf16, #tpu.memory_space<vmem>>, vector<32x32xbf16>
    %cst_5 = arith.constant dense<0.000000e+00> : vector<16x32xf32>
    %4 = tpu.matmul %0, %3, %cst_5 {dimension_numbers = #tpu.dot_dimension_numbers<[1], [0], [0], [1], [0, 0, 1, 1], [], []>} : vector<16x32xbf16>, vector<32x32xbf16>, vector<16x32xf32> -> vector<16x32xf32>
    %c0_6 = arith.constant 0 : index
    %c0_7 = arith.constant 0 : index
    %5 = vector.load %arg4[%c0_6, %c0_7] : memref<32x32xbf16, #tpu.memory_space<vmem>>, vector<32x32xbf16>
    %cst_8 = arith.constant dense<0.000000e+00> : vector<16x32xf32>
    %6 = tpu.matmul %0, %5, %cst_8 {dimension_numbers = #tpu.dot_dimension_numbers<[1], [0], [0], [1], [0, 0, 1, 1], [], []>} : vector<16x32xbf16>, vector<32x32xbf16>, vector<16x32xf32> -> vector<16x32xf32>
    %7 = vector.extract_strided_slice %2 {offsets = [0, 0], sizes = [16, 8], strides = [1, 1]} : vector<16x32xf32> to vector<16x8xf32>
    %8 = vector.shape_cast %7 : vector<16x8xf32> to vector<2x8x8xf32>
    %9 = vector.extract_strided_slice %4 {offsets = [0, 0], sizes = [16, 8], strides = [1, 1]} : vector<16x32xf32> to vector<16x8xf32>
    %10 = vector.shape_cast %9 : vector<16x8xf32> to vector<2x8x8xf32>
    %11 = vector.extract_strided_slice %6 {offsets = [0, 0], sizes = [16, 8], strides = [1, 1]} : vector<16x32xf32> to vector<16x8xf32>
    %12 = vector.shape_cast %11 : vector<16x8xf32> to vector<2x8x8xf32>
    %13 = arith.truncf %8 : vector<2x8x8xf32> to vector<2x8x8xbf16>
    %14 = arith.truncf %10 : vector<2x8x8xf32> to vector<2x8x8xbf16>
    "tpu.trace_start"() <{level = 10 : i32, message = "bqd,bkd->bqk"}> : () -> ()
    %cst_9 = arith.constant dense<0.000000e+00> : vector<2x8x8xf32>
    %15 = tpu.matmul %13, %14, %cst_9 {dimension_numbers = #tpu.dot_dimension_numbers<[2], [2], [1], [1], [0, 0, 0, 1, 1, 1], [0], [0]>} : vector<2x8x8xbf16>, vector<2x8x8xbf16>, vector<2x8x8xf32> -> vector<2x8x8xf32>
    "tpu.trace_stop"() : () -> ()
    %cst_10 = arith.constant 0.353553385 : f32
    %16 = vector.broadcast %cst_10 : f32 to vector<2x8x8xf32>
    %17 = arith.mulf %15, %16 : vector<2x8x8xf32>
    %cst_11 = arith.constant dense<0xFF800000> : vector<2x8xf32>
    %18 = vector.multi_reduction <maximumf>, %17, %cst_11 [2] : vector<2x8x8xf32> to vector<2x8xf32>
    %19 = vector.shape_cast %18 : vector<2x8xf32> to vector<2x8x1xf32>
    %20 = vector.broadcast %19 : vector<2x8x1xf32> to vector<2x8x8xf32>
    %21 = arith.subf %17, %20 : vector<2x8x8xf32>
    %22 = math.exp %21 : vector<2x8x8xf32>
    %cst_12 = arith.constant dense<0.000000e+00> : vector<2x8xf32>
    %23 = vector.multi_reduction <add>, %22, %cst_12 [2] : vector<2x8x8xf32> to vector<2x8xf32>
    %24 = vector.shape_cast %23 : vector<2x8xf32> to vector<2x8x1xf32>
    %25 = tpu.reciprocal %24 {approx = true} : vector<2x8x1xf32> -> vector<2x8x1xf32>
    %26 = vector.broadcast %25 : vector<2x8x1xf32> to vector<2x8x8xf32>
    %27 = arith.mulf %22, %26 : vector<2x8x8xf32>
    %28 = arith.truncf %27 : vector<2x8x8xf32> to vector<2x8x8xbf16>
    %29 = arith.truncf %12 : vector<2x8x8xf32> to vector<2x8x8xbf16>
    "tpu.trace_start"() <{level = 10 : i32, message = "bqk,bkd->bqd"}> : () -> ()
    %cst_13 = arith.constant dense<0.000000e+00> : vector<2x8x8xf32>
    %30 = tpu.matmul %28, %29, %cst_13 {dimension_numbers = #tpu.dot_dimension_numbers<[2], [1], [1], [2], [0, 0, 0, 1, 1, 2], [0], [0]>} : vector<2x8x8xbf16>, vector<2x8x8xbf16>, vector<2x8x8xf32> -> vector<2x8x8xf32>
    "tpu.trace_stop"() : () -> ()
    %31 = vector.shape_cast %30 : vector<2x8x8xf32> to vector<16x8xf32>
    %c0_14 = arith.constant 0 : index
    %c0_15 = arith.constant 0 : index
    %32 = vector.load %arg7[%c0_14, %c0_15] : memref<16x32xf32, #tpu.memory_space<vmem>>, vector<16x8xf32>
    tpu.vector_store %arg7[%c0_14, %c0_15], %31 {strides = array<i32>} : memref<16x32xf32, #tpu.memory_space<vmem>>, vector<16x8xf32>,
    %33 = vector.extract_strided_slice %2 {offsets = [0, 8], sizes = [16, 8], strides = [1, 1]} : vector<16x32xf32> to vector<16x8xf32>
    %34 = vector.shape_cast %33 : vector<16x8xf32> to vector<2x8x8xf32>
    %35 = vector.extract_strided_slice %4 {offsets = [0, 8], sizes = [16, 8], strides = [1, 1]} : vector<16x32xf32> to vector<16x8xf32>
    %36 = vector.shape_cast %35 : vector<16x8xf32> to vector<2x8x8xf32>
    %37 = vector.extract_strided_slice %6 {offsets = [0, 8], sizes = [16, 8], strides = [1, 1]} : vector<16x32xf32> to vector<16x8xf32>
    %38 = vector.shape_cast %37 : vector<16x8xf32> to vector<2x8x8xf32>
    %39 = arith.truncf %34 : vector<2x8x8xf32> to vector<2x8x8xbf16>
    %40 = arith.truncf %36 : vector<2x8x8xf32> to vector<2x8x8xbf16>
    "tpu.trace_start"() <{level = 10 : i32, message = "bqd,bkd->bqk"}> : () -> ()
    %cst_16 = arith.constant dense<0.000000e+00> : vector<2x8x8xf32>
    %41 = tpu.matmul %39, %40, %cst_16 {dimension_numbers = #tpu.dot_dimension_numbers<[2], [2], [1], [1], [0, 0, 0, 1, 1, 1], [0], [0]>} : vector<2x8x8xbf16>, vector<2x8x8xbf16>, vector<2x8x8xf32> -> vector<2x8x8xf32>
    "tpu.trace_stop"() : () -> ()
    %cst_17 = arith.constant 0.353553385 : f32
    %42 = vector.broadcast %cst_17 : f32 to vector<2x8x8xf32>
    %43 = arith.mulf %41, %42 : vector<2x8x8xf32>
    %cst_18 = arith.constant dense<0xFF800000> : vector<2x8xf32>
    %44 = vector.multi_reduction <maximumf>, %43, %cst_18 [2] : vector<2x8x8xf32> to vector<2x8xf32>
    %45 = vector.shape_cast %44 : vector<2x8xf32> to vector<2x8x1xf32>
    %46 = vector.broadcast %45 : vector<2x8x1xf32> to vector<2x8x8xf32>
    %47 = arith.subf %43, %46 : vector<2x8x8xf32>
    %48 = math.exp %47 : vector<2x8x8xf32>
    %cst_19 = arith.constant dense<0.000000e+00> : vector<2x8xf32>
    %49 = vector.multi_reduction <add>, %48, %cst_19 [2] : vector<2x8x8xf32> to vector<2x8xf32>
    %50 = vector.shape_cast %49 : vector<2x8xf32> to vector<2x8x1xf32>
    %51 = tpu.reciprocal %50 {approx = true} : vector<2x8x1xf32> -> vector<2x8x1xf32>
    %52 = vector.broadcast %51 : vector<2x8x1xf32> to vector<2x8x8xf32>
    %53 = arith.mulf %48, %52 : vector<2x8x8xf32>
    %54 = arith.truncf %53 : vector<2x8x8xf32> to vector<2x8x8xbf16>
    %55 = arith.truncf %38 : vector<2x8x8xf32> to vector<2x8x8xbf16>
    "tpu.trace_start"() <{level = 10 : i32, message = "bqk,bkd->bqd"}> : () -> ()
    %cst_20 = arith.constant dense<0.000000e+00> : vector<2x8x8xf32>
    %56 = tpu.matmul %54, %55, %cst_20 {dimension_numbers = #tpu.dot_dimension_numbers<[2], [1], [1], [2], [0, 0, 0, 1, 1, 2], [0], [0]>} : vector<2x8x8xbf16>, vector<2x8x8xbf16>, vector<2x8x8xf32> -> vector<2x8x8xf32>
    "tpu.trace_stop"() : () -> ()
    %57 = vector.shape_cast %56 : vector<2x8x8xf32> to vector<16x8xf32>
    %c0_21 = arith.constant 0 : index
    %c8 = arith.constant 8 : index
    %58 = vector.load %arg7[%c0_21, %c8] : memref<16x32xf32, #tpu.memory_space<vmem>>, vector<16x8xf32>
    tpu.vector_store %arg7[%c0_21, %c8], %57 {strides = array<i32>} : memref<16x32xf32, #tpu.memory_space<vmem>>, vector<16x8xf32>,
    %59 = vector.extract_strided_slice %2 {offsets = [0, 16], sizes = [16, 8], strides = [1, 1]} : vector<16x32xf32> to vector<16x8xf32>
    %60 = vector.shape_cast %59 : vector<16x8xf32> to vector<2x8x8xf32>
    %61 = vector.extract_strided_slice %4 {offsets = [0, 16], sizes = [16, 8], strides = [1, 1]} : vector<16x32xf32> to vector<16x8xf32>
    %62 = vector.shape_cast %61 : vector<16x8xf32> to vector<2x8x8xf32>
    %63 = vector.extract_strided_slice %6 {offsets = [0, 16], sizes = [16, 8], strides = [1, 1]} : vector<16x32xf32> to vector<16x8xf32>
    %64 = vector.shape_cast %63 : vector<16x8xf32> to vector<2x8x8xf32>
    %65 = arith.truncf %60 : vector<2x8x8xf32> to vector<2x8x8xbf16>
    %66 = arith.truncf %62 : vector<2x8x8xf32> to vector<2x8x8xbf16>
    "tpu.trace_start"() <{level = 10 : i32, message = "bqd,bkd->bqk"}> : () -> ()
    %cst_22 = arith.constant dense<0.000000e+00> : vector<2x8x8xf32>
    %67 = tpu.matmul %65, %66, %cst_22 {dimension_numbers = #tpu.dot_dimension_numbers<[2], [2], [1], [1], [0, 0, 0, 1, 1, 1], [0], [0]>} : vector<2x8x8xbf16>, vector<2x8x8xbf16>, vector<2x8x8xf32> -> vector<2x8x8xf32>
    "tpu.trace_stop"() : () -> ()
    %cst_23 = arith.constant 0.353553385 : f32
    %68 = vector.broadcast %cst_23 : f32 to vector<2x8x8xf32>
    %69 = arith.mulf %67, %68 : vector<2x8x8xf32>
    %cst_24 = arith.constant dense<0xFF800000> : vector<2x8xf32>
    %70 = vector.multi_reduction <maximumf>, %69, %cst_24 [2] : vector<2x8x8xf32> to vector<2x8xf32>
    %71 = vector.shape_cast %70 : vector<2x8xf32> to vector<2x8x1xf32>
    %72 = vector.broadcast %71 : vector<2x8x1xf32> to vector<2x8x8xf32>
    %73 = arith.subf %69, %72 : vector<2x8x8xf32>
    %74 = math.exp %73 : vector<2x8x8xf32>
    %cst_25 = arith.constant dense<0.000000e+00> : vector<2x8xf32>
    %75 = vector.multi_reduction <add>, %74, %cst_25 [2] : vector<2x8x8xf32> to vector<2x8xf32>
    %76 = vector.shape_cast %75 : vector<2x8xf32> to vector<2x8x1xf32>
    %77 = tpu.reciprocal %76 {approx = true} : vector<2x8x1xf32> -> vector<2x8x1xf32>
    %78 = vector.broadcast %77 : vector<2x8x1xf32> to vector<2x8x8xf32>
    %79 = arith.mulf %74, %78 : vector<2x8x8xf32>
    %80 = arith.truncf %79 : vector<2x8x8xf32> to vector<2x8x8xbf16>
    %81 = arith.truncf %64 : vector<2x8x8xf32> to vector<2x8x8xbf16>
    "tpu.trace_start"() <{level = 10 : i32, message = "bqk,bkd->bqd"}> : () -> ()
    %cst_26 = arith.constant dense<0.000000e+00> : vector<2x8x8xf32>
    %82 = tpu.matmul %80, %81, %cst_26 {dimension_numbers = #tpu.dot_dimension_numbers<[2], [1], [1], [2], [0, 0, 0, 1, 1, 2], [0], [0]>} : vector<2x8x8xbf16>, vector<2x8x8xbf16>, vector<2x8x8xf32> -> vector<2x8x8xf32>
    "tpu.trace_stop"() : () -> ()
    %83 = vector.shape_cast %82 : vector<2x8x8xf32> to vector<16x8xf32>
    %c0_27 = arith.constant 0 : index
    %c16 = arith.constant 16 : index
    %84 = vector.load %arg7[%c0_27, %c16] : memref<16x32xf32, #tpu.memory_space<vmem>>, vector<16x8xf32>
    tpu.vector_store %arg7[%c0_27, %c16], %83 {strides = array<i32>} : memref<16x32xf32, #tpu.memory_space<vmem>>, vector<16x8xf32>,
    %85 = vector.extract_strided_slice %2 {offsets = [0, 24], sizes = [16, 8], strides = [1, 1]} : vector<16x32xf32> to vector<16x8xf32>
    %86 = vector.shape_cast %85 : vector<16x8xf32> to vector<2x8x8xf32>
    %87 = vector.extract_strided_slice %4 {offsets = [0, 24], sizes = [16, 8], strides = [1, 1]} : vector<16x32xf32> to vector<16x8xf32>
    %88 = vector.shape_cast %87 : vector<16x8xf32> to vector<2x8x8xf32>
    %89 = vector.extract_strided_slice %6 {offsets = [0, 24], sizes = [16, 8], strides = [1, 1]} : vector<16x32xf32> to vector<16x8xf32>
    %90 = vector.shape_cast %89 : vector<16x8xf32> to vector<2x8x8xf32>
    %91 = arith.truncf %86 : vector<2x8x8xf32> to vector<2x8x8xbf16>
    %92 = arith.truncf %88 : vector<2x8x8xf32> to vector<2x8x8xbf16>
    "tpu.trace_start"() <{level = 10 : i32, message = "bqd,bkd->bqk"}> : () -> ()
    %cst_28 = arith.constant dense<0.000000e+00> : vector<2x8x8xf32>
    %93 = tpu.matmul %91, %92, %cst_28 {dimension_numbers = #tpu.dot_dimension_numbers<[2], [2], [1], [1], [0, 0, 0, 1, 1, 1], [0], [0]>} : vector<2x8x8xbf16>, vector<2x8x8xbf16>, vector<2x8x8xf32> -> vector<2x8x8xf32>
    "tpu.trace_stop"() : () -> ()
    %cst_29 = arith.constant 0.353553385 : f32
    %94 = vector.broadcast %cst_29 : f32 to vector<2x8x8xf32>
    %95 = arith.mulf %93, %94 : vector<2x8x8xf32>
    %cst_30 = arith.constant dense<0xFF800000> : vector<2x8xf32>
    %96 = vector.multi_reduction <maximumf>, %95, %cst_30 [2] : vector<2x8x8xf32> to vector<2x8xf32>
    %97 = vector.shape_cast %96 : vector<2x8xf32> to vector<2x8x1xf32>
    %98 = vector.broadcast %97 : vector<2x8x1xf32> to vector<2x8x8xf32>
    %99 = arith.subf %95, %98 : vector<2x8x8xf32>
    %100 = math.exp %99 : vector<2x8x8xf32>
    %cst_31 = arith.constant dense<0.000000e+00> : vector<2x8xf32>
    %101 = vector.multi_reduction <add>, %100, %cst_31 [2] : vector<2x8x8xf32> to vector<2x8xf32>
    %102 = vector.shape_cast %101 : vector<2x8xf32> to vector<2x8x1xf32>
    %103 = tpu.reciprocal %102 {approx = true} : vector<2x8x1xf32> -> vector<2x8x1xf32>
    %104 = vector.broadcast %103 : vector<2x8x1xf32> to vector<2x8x8xf32>
    %105 = arith.mulf %100, %104 : vector<2x8x8xf32>
    %106 = arith.truncf %105 : vector<2x8x8xf32> to vector<2x8x8xbf16>
    %107 = arith.truncf %90 : vector<2x8x8xf32> to vector<2x8x8xbf16>
    "tpu.trace_start"() <{level = 10 : i32, message = "bqk,bkd->bqd"}> : () -> ()
    %cst_32 = arith.constant dense<0.000000e+00> : vector<2x8x8xf32>
    %108 = tpu.matmul %106, %107, %cst_32 {dimension_numbers = #tpu.dot_dimension_numbers<[2], [1], [1], [2], [0, 0, 0, 1, 1, 2], [0], [0]>} : vector<2x8x8xbf16>, vector<2x8x8xbf16>, vector<2x8x8xf32> -> vector<2x8x8xf32>
    "tpu.trace_stop"() : () -> ()
    %109 = vector.shape_cast %108 : vector<2x8x8xf32> to vector<16x8xf32>
    %c0_33 = arith.constant 0 : index
    %c24 = arith.constant 24 : index
    %110 = vector.load %arg7[%c0_33, %c24] : memref<16x32xf32, #tpu.memory_space<vmem>>, vector<16x8xf32>
    tpu.vector_store %arg7[%c0_33, %c24], %109 {strides = array<i32>} : memref<16x32xf32, #tpu.memory_space<vmem>>, vector<16x8xf32>,
    %c0_34 = arith.constant 0 : index
    %c0_35 = arith.constant 0 : index
    %111 = vector.load %arg7[%c0_34, %c0_35] : memref<16x32xf32, #tpu.memory_space<vmem>>, vector<16x32xf32>
    %112 = arith.truncf %111 : vector<16x32xf32> to vector<16x32xbf16>
    %c0_36 = arith.constant 0 : index
    %c0_37 = arith.constant 0 : index
    %113 = vector.load %arg5[%c0_36, %c0_37] : memref<32x32xbf16, #tpu.memory_space<vmem>>, vector<32x32xbf16>
    %cst_38 = arith.constant dense<0.000000e+00> : vector<16x32xf32>
    %114 = tpu.matmul %112, %113, %cst_38 {dimension_numbers = #tpu.dot_dimension_numbers<[1], [0], [0], [1], [0, 0, 1, 1], [], []>} : vector<16x32xbf16>, vector<32x32xbf16>, vector<16x32xf32> -> vector<16x32xf32>
    %115 = vector.shape_cast %114 : vector<16x32xf32> to vector<1x16x32xf32>
    %cst_39 = arith.constant dense<0.000000e+00> : vector<1xf32>
    %116 = vector.multi_reduction <add>, %115, %cst_39 [1, 2] : vector<1x16x32xf32> to vector<1xf32>
    %117 = vector.shape_cast %116 : vector<1xf32> to vector<1x1x1xf32>
    %118 = vector.extract %117[0, 0, 0] : f32 from vector<1x1x1xf32>
    %119 = vector.broadcast %118 : f32 to vector<1x8x128xf32>
    %c0_40 = arith.constant 0 : index
    %c0_41 = arith.constant 0 : index
    %c0_42 = arith.constant 0 : index
    %120 = vector.load %arg6[%c0_40, %c0_41, %c0_42] : memref<1x8x128xf32, #tpu.memory_space<vmem>>, vector<1x8x128xf32>
    tpu.vector_store %arg6[%c0_40, %c0_41, %c0_42], %119 {strides = array<i32>} : memref<1x8x128xf32, #tpu.memory_space<vmem>>, vector<1x8x128xf32>,
    return
  }
  func.func @transform_0(%arg0: i32) -> (i32, i32) {
    %c0_i32 = arith.constant 0 : i32
    %c0_i32_0 = arith.constant 0 : i32
    return %arg0, %c0_i32 : i32, i32
  }
  func.func @transform_1(%arg0: i32) -> (i32, i32) {
    %c0_i32 = arith.constant 0 : i32
    %c0_i32_0 = arith.constant 0 : i32
    %c0_i32_1 = arith.constant 0 : i32
    return %c0_i32, %c0_i32_0 : i32, i32
  }
  func.func @transform_2(%arg0: i32) -> (i32, i32) {
    %c0_i32 = arith.constant 0 : i32
    %c0_i32_0 = arith.constant 0 : i32
    %c0_i32_1 = arith.constant 0 : i32
    return %c0_i32, %c0_i32_0 : i32, i32
  }
  func.func @transform_3(%arg0: i32) -> (i32, i32) {
    %c0_i32 = arith.constant 0 : i32
    %c0_i32_0 = arith.constant 0 : i32
    %c0_i32_1 = arith.constant 0 : i32
    return %c0_i32, %c0_i32_0 : i32, i32
  }
  func.func @transform_4(%arg0: i32) -> (i32, i32) {
    %c0_i32 = arith.constant 0 : i32
    %c0_i32_0 = arith.constant 0 : i32
    %c0_i32_1 = arith.constant 0 : i32
    return %c0_i32, %c0_i32_0 : i32, i32
  }
  func.func @transform_5(%arg0: i32) -> (i32, i32, i32) {
    %c0_i32 = arith.constant 0 : i32
    %c0_i32_0 = arith.constant 0 : i32
    %c0_i32_1 = arith.constant 0 : i32
    return %arg0, %c0_i32, %c0_i32_0 : i32, i32, i32
  }
}

</mosaic_0001>

<bundles_post_ra>
// kernel: tpu_custom_call.1
= control target key start
LH: loop header
LB: loop body
LE: loop exit
PB: predicated region body
PF: predicated region fallthrough
CT: control target
= control target key end

     0   :  { %10 = vsyncpa [#allocation4], 0  ;;  %s1194_s0 = inlined_call_operand.hbm [shape: bf16[16,32], index: 0, kind: input, shape index: {}]   ;;  %s1195_s1 = inlined_call_operand.hbm [shape: bf16[32,32], index: 1, kind: input, shape index: {}]   ;;  %s1196_s2 = inlined_call_operand.hbm [shape: bf16[32,32], index: 2, kind: input, shape index: {}]   ;;  %s1197_s3 = inlined_call_operand.hbm [shape: bf16[32,32], index: 3, kind: input, shape index: {}]   ;;  %s1198_s4 = inlined_call_operand.hbm [shape: bf16[32,32], index: 4, kind: input, shape index: {}]   ;;  %s1199_s5 = inlined_call_operand.hbm [shape: f32[1,8,128], index: 5, kind: output, shape index: {}]  }
   0x1   :  { %11 = vsyncpa [#allocation7], 0 }
   0x2   :  { %12 = vsyncpa [#allocation10], 0 }
   0x3   :  { %13 = vsyncpa [#allocation5], 0  ;;  %s31_s20 = sshll.u32 %s1195_s1, 4  ;;  %s1040_s21 = smov [#allocation6]   ;;  %s32_s20 = int_to_ptr.hbm [resolvable:$true] %s31_s20 }
   0x4   :  { %s33_s22 = sshll.u32 %s1040_s21, 4  ;;  %s57_s25 = sshll.u32 %s1197_s3, 4  ;;  %s34_s22 = int_to_ptr.vmem [resolvable:$true] %s33_s22  ;;  %s58_s25 = int_to_ptr.hbm [resolvable:$true] %s57_s25 }
   0x5   :  { %s1041_s26 = smov 64   ;;  %s1042_s27 = smov 4  }
   0x6   :  { %39 = dma.hbm_to_vmem [thread:$0]  %s32_s20, 256, %s34_s22, [#allocation7], %s1041_s26, %s1041_s26, %s1042_s27  }
   0x7   :  { %s1043_s28 = smov [#allocation9]   ;;  %s18_s7 = sshll.u32 %s1194_s0, 4  ;;  %s19_s7 = int_to_ptr.hbm [resolvable:$true] %s18_s7 }
   0x8   :  { %s59_s29 = sshll.u32 %s1043_s28, 4  ;;  %s44_s9 = sshll.u32 %s1196_s2, 4  ;;  %s60_s29 = int_to_ptr.vmem [resolvable:$true] %s59_s29  ;;  %s45_s9 = int_to_ptr.hbm [resolvable:$true] %s44_s9 }
   0x9   :  { %65 = dma.hbm_to_vmem [thread:$0]  %s58_s25, 256, %s60_s29, [#allocation10], %s1041_s26, %s1041_s26, %s1042_s27  }
   0xa   :  { %s1044_s10 = smov [#allocation3]   ;;  %s1045_s3 = smov [#allocation8]  }
   0xb   :  { %s20_s11 = sshll.u32 %s1044_s10, 4  ;;  %s46_s12 = sshll.u32 %s1045_s3, 4  ;;  %s21_s11 = int_to_ptr.vmem [resolvable:$true] %s20_s11  ;;  %s47_s12 = int_to_ptr.vmem [resolvable:$true] %s46_s12 }
   0xc   :  { %26 = dma.hbm_to_vmem [thread:$0]  %s19_s7, 128, %s21_s11, [#allocation4], %s1041_s26, %s1041_s26, %s1042_s27  }
   0xd   :  { %s70_s15 = sshll.u32 %s1198_s4, 4  ;;  %s1046_s0 = smov [#allocation11]   ;;  %s71_s15 = int_to_ptr.hbm [resolvable:$true] %s70_s15 }
   0xe   :  { %52 = dma.hbm_to_vmem [thread:$0]  %s45_s9, 256, %s47_s12, [#allocation7], %s1041_s26, %s1041_s26, %s1042_s27  }
   0xf   :  { %s72_s16 = sshll.u32 %s1046_s0, 4  ;;  %s73_s16 = int_to_ptr.vmem [resolvable:$true] %s72_s16 }
  0x10   :  { %78 = dma.hbm_to_vmem [thread:$0]  %s71_s15, 256, %s73_s16, [#allocation10], %s1041_s26, %s1041_s26, %s1042_s27  }
  0x11   :  { %1032 = dma.done.wait [#allocation4], 128  }
  0x12   :  { %1033 = vsyncadd [#allocation4], 4294967168 }
  0x13   :  { %1034 = dma.done.wait [#allocation7], 512  }
  0x14   :  { %1035 = vsyncadd [#allocation7], 4294966784 }
  0x15   :  { %1036 = dma.done.wait [#allocation10], 512  }
  0x16   :  { %1037 = vsyncadd [#allocation10], 4294966784  ;;  %v833_v0 = vld [vmem:[#allocation6 + $0x8] sm:$0xff]  ;;  %v835_v1 = vld [vmem:[#allocation8 + $0x8] sm:$0xff]  ;;  %vm123_vm0 = vcmask 261120   ;;  %vm205_vm1 = vcmask 64512  }
  0x17   :  { %133 = vmatpush.bf16.msra.mxu0 %v833_v0  ;;  %163 = vmatpush.bf16.msra.mxu1 %v835_v1  ;;  %v832_v2 = vld [vmem:[#allocation6] sm:$0xff]  ;;  %v834_v3 = vld [vmem:[#allocation8] sm:$0xff]  ;;  %v1099_v4 = vld [vmem:[#allocation3] sm:$0xff]  ;;  %s1047_s2 = smov 112   ;;  %s1048_s4 = smov 120   ;;  %vm275_vm2 = vcmask 1043456  }
  0x18   :  { %s1049_s17 = smov 104   ;;  %v837_v36 = vld [vmem:[#allocation9 + $0x8] sm:$0xff]  ;;  %v836_v37 = vld [vmem:[#allocation9] sm:$0xff]  ;;  %s1050_s18 = smov 8   ;;  %vm453_vm3 = vcmask 130112   ;;  %vm578_vm4 = vcmask 195712  }
  0x19   :  { %193 = vmatpush.bf16.msra.mxu2 %v837_v36  ;;  %s1051_s19 = smov 16   ;;  %s1052_s20 = smov 24   ;;  %vm703_vm5 = vcmask 261312  }
  0x1a   :  { %s1053_s21 = smov [#allocation12]   ;;  %s763_s25 = sshll.u32 %s1199_s5, 4  ;;  %s764_s25 = int_to_ptr.hbm [resolvable:$true] %s763_s25 }
  0x1b   :  { %134 = vmatpush.bf16.msra.mxu0 %v832_v2  ;;  %164 = vmatpush.bf16.msra.mxu1 %v834_v3  ;;  %s761_s22 = sshll.u32 %s1053_s21, 4  ;;  %s762_s22 = int_to_ptr.vmem [resolvable:$true] %s761_s22 }
  0x1d   :  { %194 = vmatpush.bf16.msra.mxu2 %v836_v37 }
  0x1e   :  { %787 = vmatmul.msk.bf16.vlgmr.msra.gmra.mxu0 %vm123_vm0, %v1099_v4  ;;  %796 = vmatmul.msk.bf16.vlgmr.msra.gmra.mxu1 %vm123_vm0, %v1099_v4 }
  0x20   :  { %805 = vmatmul.msk.bf16.vlgmr.msra.gmra.mxu2 %vm123_vm0, %v1099_v4 }
  0x9b   :  { %v136_v5 = vpop.f32.mrf.mxu0  ;;  %v166_v6 = vpop.f32.mrf.mxu1 }
  0x9c   :  { %v201_v7 = vpack.c.bf16 %v136_v5, %v136_v5  ;;  %v203_v8 = vpack.c.bf16 %v166_v6, %v166_v6 }
  0x9e   :  { %v314_v9 = vunpack.c.l.b16 %v201_v7  ;;  %v319_v10 = vunpack.c.l.b16 %v203_v8  ;;  %v210_v11 = vsel %vm205_vm1, %v203_v8, 0 }
  0x9f   :  { %219 = vmatpush.bf16.xpose.msra.mxu3 %v210_v11 }
  0xa0   :  { %v315_v12 = vpack.c.b16 %v314_v9, %v314_v9  ;;  %v320_v13 = vpack.c.b16 %v319_v10, %v319_v10 }
  0xa2   :  { %458 = vrot.lane.b32.xlu2 %v320_v13, %s1047_s2  ;;  %321 = vrot.lane.b32.xlu0 %v320_v13, %s1048_s4 }
  0xa3   :  { %316 = vrot.lane.b32.xlu1 %v315_v12, %s1048_s4  ;;  %v138_v14 = vpop.f32.mrf.mxu0  ;;  %v168_v15 = vpop.f32.mrf.mxu1 }
  0xa4   :  { %v202_v16 = vpack.c.bf16 %v138_v14, %v138_v14  ;;  %v204_v17 = vpack.c.bf16 %v168_v15, %v168_v15  ;;  %v196_v5 = vpop.f32.mrf.mxu2 }
  0xa5   :  { %v270_v8 = vpack.c.bf16 %v196_v5, %v196_v5 }
  0xa6   :  { %v343_v18 = vunpack.c.l.b16 %v202_v16  ;;  %v348_v19 = vunpack.c.l.b16 %v204_v17  ;;  %806 = vmatmul.msk.bf16.vlgmr.msra.gmra.mxu3 %vm205_vm1, %v201_v7  ;;  %v229_v20 = vsel %vm205_vm1, %v204_v17, 0 }
  0xa7   :  { %238 = vmatpush.bf16.xpose.msrb.mxu0 %v229_v20  ;;  %v277_v11 = vsel %vm275_vm2, %v270_v8, 0 }
  0xa8   :  { %v344_v21 = vpack.c.b16 %v343_v18, %v343_v18  ;;  %v349_v22 = vpack.c.b16 %v348_v19, %v348_v19  ;;  %286 = vmatpush.bf16.msrb.mxu1 %v277_v11 }
  0xaa   :  { %481 = vrot.lane.b32.xlu2 %v349_v22, %s1047_s2  ;;  %350 = vrot.lane.b32.xlu0 %v349_v22, %s1048_s4 }
  0xab   :  { %345 = vrot.lane.b32.xlu1 %v344_v21, %s1048_s4 }
  0xac   :  { %v198_v15 = vpop.f32.mrf.mxu2 }
  0xad   :  { %v271_v17 = vpack.c.bf16 %v198_v15, %v198_v15 }
  0xae   :  { %807 = vmatmul.msk.bf16.vlgmr.msrb.gmra.mxu0 %vm205_vm1, %v202_v16 }
  0xaf   :  { %v296_v18 = vsel %vm275_vm2, %v271_v17, 0 }
  0xb0   :  { %305 = vmatpush.bf16.msrb.mxu2 %v296_v18 }
  0xb2   :  { %583 = vrot.lane.b32.xlu2 %v320_v13, %s1049_s17  ;;  %456 = vrot.lane.b32.xlu0 %v315_v12, %s1047_s2 }
  0xb3   :  { %479 = vrot.lane.b32.xlu1 %v344_v21, %s1047_s2 }
  0xba   :  { %606 = vrot.lane.b32.xlu0 %v349_v22, %s1049_s17  ;;  %604 = vrot.lane.b32.xlu2 %v344_v21, %s1049_s17 }
  0xbb   :  { %581 = vrot.lane.b32.xlu1 %v315_v12, %s1049_s17 }
  0xfc   :  { %v459_v23 = vpop.permute.xlu2 %458 }
  0xfd   :  { %v464_v27 = vsel %vm205_vm1, %v459_v23, 0 }
 0x104   :  { %v482_v24 = vpop.permute.xlu2 %481 }
 0x105   :  { %v487_v33 = vsel %vm205_vm1, %v482_v24, 0  ;;  %v398_v24 = vunpack.c.l.b16 %v270_v8 }
 0x10c   :  { %v584_v28 = vpop.permute.xlu2 %583 }
 0x10d   :  { %v589_v31 = vsel %vm205_vm1, %v584_v28, 0 }
 0x114   :  { %v322_v25 = vpop.permute.xlu0 %321  ;;  %v605_v50 = vpop.permute.xlu2 %604 }
 0x115   :  { %v327_v26 = vsel %vm205_vm1, %v322_v25, 0  ;;  %v317_v29 = vpop.permute.xlu1 %316 }
 0x116   :  { %336 = vmatpush.bf16.xpose.msrb.mxu3 %v327_v26  ;;  %v1153_v26 = vpack.c.b16 %v398_v24, %v398_v24 }
 0x11c   :  { %v351_v30 = vpop.permute.xlu0 %350 }
 0x11d   :  { %v356_v32 = vsel %vm205_vm1, %v351_v30, 0  ;;  %810 = vmatmul.msk.bf16.vlgmr.msrb.gmra.mxu3 %vm205_vm1, %v317_v29  ;;  %v346_v34 = vpop.permute.xlu1 %345  ;;  %v422_v29 = vunpack.c.l.b16 %v271_v17 }
 0x11e   :  { %473 = vmatpush.bf16.xpose.msra.mxu3 %v464_v27  ;;  %365 = vmatpush.bf16.xpose.msra.mxu0 %v356_v32 }
 0x11f   :  { %v423_v30 = vpack.c.b16 %v422_v29, %v422_v29 }
 0x124   :  { %v457_v35 = vpop.permute.xlu0 %456 }
 0x125   :  { %811 = vmatmul.msk.bf16.vlgmr.msra.gmra.mxu0 %vm205_vm1, %v346_v34  ;;  %v480_v47 = vpop.permute.xlu1 %479 }
 0x126   :  { %598 = vmatpush.bf16.xpose.msrb.mxu3 %v589_v31  ;;  %496 = vmatpush.bf16.xpose.msrb.mxu0 %v487_v33 }
 0x129   :  { %v221_v38 = vpop.f32.mrf.mxu3 }
 0x12a   :  { %v244_v39 = vmul.f32 0.35355338, %v221_v38 }
 0x12b   :  { %v240_v40 = vpop.f32.mrf.mxu0 }
 0x12c   :  { %v245_v41 = vmul.f32 0.35355338, %v240_v40  ;;  %v607_v42 = vpop.permute.xlu0 %606  ;;  %v246_v43 = vsel %vm205_vm1, %v244_v39, -inf }
 0x12d   :  { %v612_v44 = vsel %vm205_vm1, %v607_v42, 0  ;;  %814 = vmatmul.msk.bf16.vlgmr.msra.gmra.mxu3 %vm205_vm1, %v457_v35  ;;  %247 = vmax.xlane.f32.xlu1 %v246_v43  ;;  %v582_v49 = vpop.permute.xlu1 %581 }
 0x12e   :  { %621 = vmatpush.bf16.xpose.msra.mxu0 %v612_v44  ;;  %v249_v45 = vsel %vm205_vm1, %v245_v41, -inf }
 0x12f   :  { %250 = vmax.xlane.f32.xlu0 %v249_v45 }
 0x131   :  { %v223_v46 = vpop.f32.mrf.mxu3 }
 0x133   :  { %v242_v48 = vpop.f32.mrf.mxu0 }
 0x135   :  { %815 = vmatmul.msk.bf16.vlgmr.msrb.gmra.mxu0 %vm205_vm1, %v480_v47 }
 0x13d   :  { %818 = vmatmul.msk.bf16.vlgmr.msrb.gmra.mxu3 %vm205_vm1, %v582_v49 }
 0x145   :  { %819 = vmatmul.msk.bf16.vlgmr.msra.gmra.mxu0 %vm205_vm1, %v605_v50 }
 0x1a0   :  { %v338_v51 = vpop.f32.mrf.mxu3  ;;  %v248_v52 = vpop.xlane.xlu1 %247 }
 0x1a1   :  { %v252_v57 = vsub.f32 %v244_v39, %v248_v52  ;;  %v371_v62 = vmul.f32 0.35355338, %v338_v51 }
 0x1a2   :  { %v251_v53 = vpop.xlane.xlu0 %250  ;;  %v367_v54 = vpop.f32.mrf.mxu0 }
 0x1a3   :  { %v253_v55 = vsub.f32 %v245_v41, %v251_v53  ;;  %v372_v56 = vmul.f32 0.35355338, %v367_v54  ;;  %v254_v60 = vmul.f32 1.442695, %v252_v57  ;;  %v373_v1 = vsel %vm205_vm1, %v371_v62, -inf }
 0x1a5   :  { %v256_v58 = vmul.f32 1.442695, %v253_v55  ;;  %v376_v59 = vsel %vm205_vm1, %v372_v56, -inf }
 0x1a6   :  { %377 = vmax.xlane.f32.xlu2 %v376_v59 }
 0x1a7   :  { %856 = vpow2.f32 %v256_v58 }
 0x1a8   :  { %v340_v61 = vpop.f32.mrf.mxu3  ;;  %858 = vpow2.f32 %v254_v60 }
 0x1aa   :  { %v369_v63 = vpop.f32.mrf.mxu0 }
 0x1ad   :  { %v857_v0 = vpop.eup %856 }
 0x1ae   :  { %374 = vmax.xlane.f32.xlu2 %v373_v1  ;;  %v261_v2 = vsel %vm205_vm1, %v857_v0, 0.0  ;;  %v1140_v6 = vpop.eup %858 }
 0x1af   :  { %262 = vadd.xlane.f32.xlu0 %v261_v2  ;;  %v258_v12 = vsel %vm205_vm1, %v1140_v6, 0.0 }
 0x1b0   :  { %v475_v3 = vpop.f32.mrf.mxu3 }
 0x1b1   :  { %v502_v4 = vmul.f32 0.35355338, %v475_v3 }
 0x1b2   :  { %v498_v7 = vpop.f32.mrf.mxu0 }
 0x1b3   :  { %v503_v9 = vmul.f32 0.35355338, %v498_v7  ;;  %v504_v10 = vsel %vm205_vm1, %v502_v4, -inf }
 0x1b4   :  { %505 = vmax.xlane.f32.xlu1 %v504_v10 }
 0x1b5   :  { %v507_v13 = vsel %vm205_vm1, %v503_v9, -inf }
 0x1b6   :  { %259 = vadd.xlane.f32.xlu2 %v258_v12 }
 0x1b7   :  { %508 = vmax.xlane.f32.xlu0 %v507_v13 }
 0x1b8   :  { %v477_v14 = vpop.f32.mrf.mxu3 }
 0x1ba   :  { %v500_v16 = vpop.f32.mrf.mxu0 }
 0x1c0   :  { %v600_v19 = vpop.f32.mrf.mxu3 }
 0x1c1   :  { %v1148_v20 = vmul.f32 0.35355338, %v600_v19 }
 0x1c2   :  { %v623_v21 = vpop.f32.mrf.mxu0 }
 0x1c3   :  { %v628_v22 = vmul.f32 0.35355338, %v623_v21  ;;  %v629_v23 = vsel %vm205_vm1, %v1148_v20, -inf }
 0x1c4   :  { %630 = vmax.xlane.f32.xlu1 %v629_v23 }
 0x1c5   :  { %v632_v25 = vsel %vm205_vm1, %v628_v22, -inf }
 0x1c6   :  { %633 = vmax.xlane.f32.xlu2 %v632_v25 }
 0x1c8   :  { %v602_v27 = vpop.f32.mrf.mxu3 }
 0x1ca   :  { %v625_v28 = vpop.f32.mrf.mxu0 }
 0x1cb   :  { %400 = vrot.lane.b32.xlu0 %v1153_v26, %s1048_s4 }
 0x1dd   :  { %549 = vrot.lane.b32.xlu1 %v423_v30, %s1047_s2 }
 0x1de   :  { %424 = vrot.lane.b32.xlu2 %v423_v30, %s1048_s4 }
 0x219   :  { %v378_v31 = vpop.xlane.xlu2 %377 }
 0x21a   :  { %v380_v32 = vsub.f32 %v372_v56, %v378_v31 }
 0x21c   :  { %v383_v33 = vmul.f32 1.442695, %v380_v32 }
 0x21e   :  { %860 = vpow2.f32 %v383_v33 }
 0x221   :  { %v375_v34 = vpop.xlane.xlu2 %374 }
 0x222   :  { %v379_v35 = vsub.f32 %v371_v62, %v375_v34  ;;  %v263_v36 = vpop.xlane.xlu0 %262 }
 0x223   :  { %862 = vrcp.f32 %v263_v36 }
 0x224   :  { %v861_v37 = vpop.eup %860  ;;  %v381_v38 = vmul.f32 1.442695, %v379_v35 }
 0x225   :  { %v388_v39 = vsel %vm205_vm1, %v861_v37, 0.0 }
 0x226   :  { %864 = vpow2.f32 %v381_v38  ;;  %389 = vadd.xlane.f32.xlu0 %v388_v39 }
 0x227   :  { %v506_v40 = vpop.xlane.xlu1 %505 }
 0x228   :  { %v510_v41 = vsub.f32 %v502_v4, %v506_v40 }
 0x229   :  { %v863_v42 = vpop.eup %862  ;;  %v260_v43 = vpop.xlane.xlu2 %259 }
 0x22a   :  { %v267_v44 = vmul.f32 %v863_v42, %v857_v0  ;;  %v512_v45 = vmul.f32 1.442695, %v510_v41  ;;  %866 = vrcp.f32 %v260_v43  ;;  %v509_v46 = vpop.xlane.xlu0 %508 }
 0x22b   :  { %v511_v48 = vsub.f32 %v503_v9, %v509_v46 }
 0x22c   :  { %v865_v47 = vpop.eup %864  ;;  %868 = vpow2.f32 %v512_v45  ;;  %v269_v49 = vpack.c.bf16 %v267_v44, %v267_v44 }
 0x22d   :  { %v385_v50 = vsel %vm205_vm1, %v865_v47, 0.0  ;;  %v514_v52 = vmul.f32 1.442695, %v511_v48 }
 0x22e   :  { %809 = vmatmul.msk.bf16.vlgmr.msrb.gmra.mxu2 %vm205_vm1, %v269_v49  ;;  %386 = vadd.xlane.f32.xlu1 %v385_v50 }
 0x22f   :  { %870 = vpow2.f32 %v514_v52 }
 0x230   :  { %v867_v51 = vpop.eup %866 }
 0x231   :  { %v266_v53 = vmul.f32 %v867_v51, %v1140_v6 }
 0x232   :  { %v869_v54 = vpop.eup %868 }
 0x233   :  { %v268_v55 = vpack.c.bf16 %v266_v53, %v266_v53  ;;  %v516_v56 = vsel %vm205_vm1, %v869_v54, 0.0 }
 0x235   :  { %808 = vmatmul.msk.bf16.vlgmr.msrb.gmra.mxu1 %vm205_vm1, %v268_v55  ;;  %v871_v58 = vpop.eup %870 }
 0x236   :  { %517 = vadd.xlane.f32.xlu1 %v516_v56  ;;  %v519_v61 = vsel %vm205_vm1, %v871_v58, 0.0 }
 0x237   :  { %v631_v4 = vpop.xlane.xlu1 %630 }
 0x238   :  { %v635_v7 = vsub.f32 %v1148_v20, %v631_v4 }
 0x239   :  { %v634_v57 = vpop.xlane.xlu2 %633 }
 0x23a   :  { %v636_v59 = vsub.f32 %v628_v22, %v634_v57  ;;  %528 = vrot.lane.b32.xlu0 %v1153_v26, %s1047_s2  ;;  %v637_v8 = vmul.f32 1.442695, %v635_v7 }
 0x23c   :  { %v639_v60 = vmul.f32 1.442695, %v636_v59 }
 0x23d   :  { %v401_v1 = vpop.permute.xlu0 %400 }
 0x23e   :  { %872 = vpow2.f32 %v639_v60  ;;  %520 = vadd.xlane.f32.xlu1 %v519_v61  ;;  %v406_v3 = vsel %vm275_vm2, %v401_v1, 0  ;;  %v839_v61 = vld [vmem:[#allocation11 + $0x8] sm:$0xff] }
 0x23f   :  { %415 = vmatpush.bf16.msra.mxu1 %v406_v3  ;;  %874 = vpow2.f32 %v637_v8  ;;  %734 = vmatpush.bf16.msra.mxu3 %v839_v61 }
 0x241   :  { %v425_v62 = vpop.permute.xlu2 %424 }
 0x242   :  { %v430_v63 = vsel %vm275_vm2, %v425_v62, 0  ;;  %v838_v62 = vld [vmem:[#allocation11] sm:$0xff] }
 0x243   :  { %439 = vmatpush.bf16.msra.mxu2 %v430_v63  ;;  %735 = vmatpush.bf16.msra.mxu3 %v838_v62 }
 0x244   :  { %v873_v0 = vpop.eup %872 }
 0x245   :  { %v644_v2 = vsel %vm205_vm1, %v873_v0, 0.0  ;;  %v875_v9 = vpop.eup %874 }
 0x246   :  { %645 = vadd.xlane.f32.xlu2 %v644_v2  ;;  %v641_v10 = vsel %vm205_vm1, %v875_v9, 0.0 }
 0x24f   :  { %v550_v5 = vpop.permute.xlu1 %549 }
 0x250   :  { %v555_v6 = vsel %vm275_vm2, %v550_v5, 0 }
 0x251   :  { %564 = vmatpush.bf16.msrb.mxu2 %v555_v6 }
 0x257   :  { %674 = vrot.lane.b32.xlu1 %v423_v30, %s1049_s17 }
 0x25f   :  { %653 = vrot.lane.b32.xlu1 %v1153_v26, %s1049_s17 }
 0x264   :  { %642 = vadd.xlane.f32.xlu0 %v641_v10 }
 0x299   :  { %v390_v11 = vpop.xlane.xlu0 %389 }
 0x29a   :  { %876 = vrcp.f32 %v390_v11 }
 0x2a0   :  { %v877_v12 = vpop.eup %876 }
 0x2a1   :  { %v394_v13 = vmul.f32 %v877_v12, %v861_v37  ;;  %v387_v14 = vpop.xlane.xlu1 %386 }
 0x2a2   :  { %878 = vrcp.f32 %v387_v14 }
 0x2a3   :  { %v396_v15 = vpack.c.bf16 %v394_v13, %v394_v13 }
 0x2a5   :  { %813 = vmatmul.msk.bf16.vlgmr.msra.gmra.mxu2 %vm205_vm1, %v396_v15 }
 0x2a8   :  { %v879_v16 = vpop.eup %878 }
 0x2a9   :  { %v393_v17 = vmul.f32 %v879_v16, %v865_v47  ;;  %v518_v18 = vpop.xlane.xlu1 %517 }
 0x2aa   :  { %880 = vrcp.f32 %v518_v18 }
 0x2ab   :  { %v395_v19 = vpack.c.bf16 %v393_v17, %v393_v17 }
 0x2ac   :  { %v529_v20 = vpop.permute.xlu0 %528 }
 0x2ad   :  { %v534_v21 = vsel %vm275_vm2, %v529_v20, 0  ;;  %812 = vmatmul.msk.bf16.vlgmr.msra.gmra.mxu1 %vm205_vm1, %v395_v19 }
 0x2ae   :  { %543 = vmatpush.bf16.msrb.mxu1 %v534_v21 }
 0x2b0   :  { %v881_v25 = vpop.eup %880 }
 0x2b1   :  { %v307_v22 = vpop.f32.mrf.mxu2  ;;  %v521_v23 = vpop.xlane.xlu1 %520  ;;  %v524_v26 = vmul.f32 %v881_v25, %v869_v54 }
 0x2b2   :  { %312 = vst.msk [vmem:[#allocation2 + $0x8] sm:$0xff] %vm205_vm1, %v307_v22  ;;  %882 = vrcp.f32 %v521_v23  ;;  %v288_v24 = vpop.f32.mrf.mxu1 }
 0x2b3   :  { %311 = vst.msk [vmem:[#allocation2] sm:$0xff] %vm205_vm1, %v288_v24  ;;  %v526_v31 = vpack.c.bf16 %v524_v26, %v524_v26 }
 0x2b8   :  { %v883_v27 = vpop.eup %882 }
 0x2b9   :  { %v525_v28 = vmul.f32 %v883_v27, %v871_v58  ;;  %v309_v29 = vpop.f32.mrf.mxu2  ;;  %v646_v33 = vpop.xlane.xlu2 %645 }
 0x2ba   :  { %v290_v30 = vpop.f32.mrf.mxu1  ;;  %884 = vrcp.f32 %v646_v33 }
 0x2bb   :  { %v527_v32 = vpack.c.bf16 %v525_v28, %v525_v28 }
 0x2bd   :  { %816 = vmatmul.msk.bf16.vlgmr.msrb.gmra.mxu1 %vm205_vm1, %v526_v31  ;;  %817 = vmatmul.msk.bf16.vlgmr.msrb.gmra.mxu2 %vm205_vm1, %v527_v32 }
 0x2c0   :  { %v885_v34 = vpop.eup %884 }
 0x2c1   :  { %v650_v35 = vmul.f32 %v885_v34, %v873_v0 }
 0x2c3   :  { %v652_v38 = vpack.c.bf16 %v650_v35, %v650_v35 }
 0x2c9   :  { %v675_v36 = vpop.permute.xlu1 %674 }
 0x2ca   :  { %v680_v37 = vsel %vm275_vm2, %v675_v36, 0 }
 0x2cb   :  { %689 = vmatpush.bf16.msra.mxu2 %v680_v37 }
 0x2ce   :  { %821 = vmatmul.msk.bf16.vlgmr.msra.gmra.mxu2 %vm205_vm1, %v652_v38 }
 0x2d1   :  { %v654_v39 = vpop.permute.xlu1 %653 }
 0x2d2   :  { %v659_v40 = vsel %vm275_vm2, %v654_v39, 0 }
 0x2d3   :  { %668 = vmatpush.bf16.msra.mxu1 %v659_v40 }
 0x2d7   :  { %v643_v41 = vpop.xlane.xlu0 %642 }
 0x2d8   :  { %886 = vrcp.f32 %v643_v41 }
 0x2de   :  { %v887_v42 = vpop.eup %886 }
 0x2df   :  { %v649_v43 = vmul.f32 %v887_v42, %v875_v9 }
 0x2e1   :  { %v651_v44 = vpack.c.bf16 %v649_v43, %v649_v43 }
 0x2e3   :  { %820 = vmatmul.msk.bf16.vlgmr.msra.gmra.mxu1 %vm205_vm1, %v651_v44 }
 0x328   :  { %v441_v45 = vpop.f32.mrf.mxu2 }
 0x329   :  { %449 = vrot.lane.b32.xlu2 %v441_v45, %s1050_s18 }
 0x32a   :  { %v417_v46 = vpop.f32.mrf.mxu1 }
 0x32b   :  { %447 = vrot.lane.b32.xlu1 %v417_v46, %s1050_s18 }
 0x330   :  { %v443_v47 = vpop.f32.mrf.mxu2 }
 0x332   :  { %v419_v48 = vpop.f32.mrf.mxu1 }
 0x33a   :  { %v545_v49 = vpop.f32.mrf.mxu1 }
 0x33b   :  { %572 = vrot.lane.b32.xlu1 %v545_v49, %s1051_s19 }
 0x340   :  { %v566_v50 = vpop.f32.mrf.mxu2 }
 0x341   :  { %574 = vrot.lane.b32.xlu0 %v566_v50, %s1051_s19 }
 0x342   :  { %v547_v51 = vpop.f32.mrf.mxu1 }
 0x348   :  { %v568_v52 = vpop.f32.mrf.mxu2 }
 0x351   :  { %v691_v53 = vpop.f32.mrf.mxu2 }
 0x359   :  { %v693_v54 = vpop.f32.mrf.mxu2 }
 0x360   :  { %v670_v55 = vpop.f32.mrf.mxu1 }
 0x361   :  { %697 = vrot.lane.b32.xlu1 %v670_v55, %s1052_s20 }
 0x368   :  { %v672_v56 = vpop.f32.mrf.mxu1 }
 0x369   :  { %699 = vrot.lane.b32.xlu1 %v691_v53, %s1052_s20 }
 0x383   :  { %v450_v57 = vpop.permute.xlu2 %449 }
 0x384   :  { %455 = vst.msk [vmem:[#allocation2 + $0x8] sm:$0xff] %vm453_vm3, %v450_v57 }
 0x39d   :  { %v448_v58 = vpop.permute.xlu1 %447 }
 0x39e   :  { %454 = vst.msk [vmem:[#allocation2] sm:$0xff] %vm453_vm3, %v448_v58 }
 0x3ad   :  { %v573_v59 = vpop.permute.xlu1 %572 }
 0x3ae   :  { %579 = vst.msk [vmem:[#allocation2] sm:$0xff] %vm578_vm4, %v573_v59 }
 0x3b3   :  { %v575_v60 = vpop.permute.xlu0 %574 }
 0x3b4   :  { %580 = vst.msk [vmem:[#allocation2 + $0x8] sm:$0xff] %vm578_vm4, %v575_v60 }
 0x3d3   :  { %v698_v63 = vpop.permute.xlu1 %697 }
 0x3d4   :  { %704 = vst.msk [vmem:[#allocation2] sm:$0xff] %vm703_vm5, %v698_v63 }
 0x3db   :  { %v700_v0 = vpop.permute.xlu1 %699  ;;  %v706_v1 = vld [vmem:[#allocation2] sm:$0xff] }
 0x3dc   :  { %705 = vst.msk [vmem:[#allocation2 + $0x8] sm:$0xff] %vm703_vm5, %v700_v0 }
 0x3e3   :  { %v707_v2 = vld [vmem:[#allocation2 + $0x8] sm:$0xff] }
 0x3e4   :  { %v708_v3 = vpack.c.bf16 %v707_v2, %v706_v1 }
 0x3e6   :  { %830 = vmatmul.msk.bf16.vlgmr.msra.gmra.mxu3 %vm123_vm0, %v708_v3 }
 0x469   :  { %v737_v4 = vpop.f32.mrf.mxu3 }
 0x46a   :  { %v742_v6 = vsel %vm123_vm0, %v737_v4, 0.0 }
 0x471   :  { %v739_v5 = vpop.f32.mrf.mxu3 }
 0x472   :  { %v743_v7 = vsel %vm123_vm0, %v739_v5, 0.0 }
 0x473   :  { %v744_v8 = vadd.f32 %v743_v7, %v742_v6 }
 0x475   :  { %745 = vadd.xlane.f32.xlu2 %v744_v8 }
 0x4e8   :  { %v746_v9 = vpop.xlane.xlu2 %745 }
 0x4e9   :  { %v747_v10 = vrot.slane %v746_v9, 4 }
 0x4eb   :  { %v748_v11 = vadd.f32 %v747_v10, %v746_v9 }
 0x4ed   :  { %v749_v12 = vrot.slane %v748_v11, 2 }
 0x4ef   :  { %v750_v13 = vadd.f32 %v749_v12, %v748_v11 }
 0x4f1   :  { %v751_v14 = vrot.slane %v750_v13, 1 }
 0x4f3   :  { %v752_v15 = vadd.f32 %v751_v14, %v750_v13 }
 0x4f5   :  { %840 = vpush %v752_v15 }
 0x526   :  { %s841_s26 = spop %840 }
 0x527   :  { %v754_v16 = vstv %s841_s26 }
 0x528   :  { %755 = vst [vmem:[#allocation12] sm:$0xff] %v754_v16 }
 0x529   :  { %766 = dma.vmem_to_hbm [thread:$0]  %s762_s22, 128, %s764_s25, [#allocation5]  }
 0x52a   :  { %1038 = dma.done.wait [#allocation5], 128  }
 0x52b   :  { %1039 = vsyncadd [#allocation5], 4294967168 }
 0x52c   :  { %771 = vsyncpa [#allocation4], 1 }
 0x52d   :  { %772 = vsyncpa [#allocation7], 1 }
 0x52e   :  { %773 = vsyncpa [#allocation10], 1 }
 0x52f   :  { %774 = vsyncpa [#allocation5], 1 }

</bundles_post_ra>
